<compile_context>
chip_gen: v5e
topology: v5e:2x2
jax: 0.10.0
libtpu: 0.0.40
codegen_flags: <defaults>
</compile_context>

<pallas_src>
import jax
import jax.numpy as jnp
from jax.experimental import pallas as pl
from jax.experimental.pallas import tpu as pltpu


def _round_up(x, m):
    return ((x + m - 1) // m) * m


def _mlp_kernel_lane_dense(x_ref, w1_ref, b1_ref, w2_ref, b2_ref, w3_ref, b3_ref, o_ref):
    """out_dim == 1 path: final projection emitted as a lane-dense (1, tm) row."""
    x = x_ref[...]                                                        # (tm, in_dim)

    # Linear(in_dim, 2*in_dim) + ReLU
    h1 = jnp.dot(x, w1_ref[...], preferred_element_type=jnp.float32) + b1_ref[...]
    h1 = jnp.maximum(h1, 0.0)                                             # (tm, hid)

    # Linear(2*in_dim, in_dim) + ReLU
    h2 = jnp.dot(h1, w2_ref[...], preferred_element_type=jnp.float32) + b2_ref[...]
    h2 = jnp.maximum(h2, 0.0)                                             # (tm, in_dim)

    # Linear(in_dim, 1) + Sigmoid.  Contract over the feature dim with the
    # batch on the RHS so the result is already (1, tm) (batch along lanes):
    # no degenerate N=1 matmul output and no masked (tm, 1) stores.
    z = jnp.einsum("od,nd->on", w3_ref[...], h2,
                   preferred_element_type=jnp.float32) + b3_ref[...]      # (1, tm)
    o_ref[...] = jax.nn.sigmoid(z).astype(o_ref.dtype)


def _mlp_kernel_general(x_ref, w1_ref, b1_ref, w2_ref, b2_ref, w3_ref, b3_ref, o_ref):
    """General out_dim > 1 fallback: standard (tm, out_dim) output blocks."""
    x = x_ref[...]
    h1 = jnp.maximum(
        jnp.dot(x, w1_ref[...], preferred_element_type=jnp.float32) + b1_ref[...], 0.0)
    h2 = jnp.maximum(
        jnp.dot(h1, w2_ref[...], preferred_element_type=jnp.float32) + b2_ref[...], 0.0)
    z = jnp.dot(h2, w3_ref[...], preferred_element_type=jnp.float32) + b3_ref[...]
    o_ref[...] = jax.nn.sigmoid(z).astype(o_ref.dtype)


def mlp_layer(x, params, *, tm=256):
    """Fused MLP forward. x: [N, in_dim] float32. Returns flattened [N*out_dim]."""
    w1, b1, w2, b2, w3, b3 = params
    N, in_dim = x.shape
    hid = w1.shape[1]
    out_dim = w3.shape[1]

    # 128-aligned row tile, clamped so small batches do not over-pad.
    tm = max(128, (min(tm, _round_up(N, 128)) // 128) * 128)
    n_pad = _round_up(N, tm)
    if n_pad != N:
        x = jnp.pad(x, ((0, n_pad - N), (0, 0)))
    grid = (n_pad // tm,)

    flops = 2 * n_pad * (in_dim * hid + hid * in_dim + in_dim * out_dim)
    bytes_accessed = 4 * (n_pad * in_dim + in_dim * hid + hid + hid * in_dim
                          + in_dim + in_dim * out_dim + out_dim + n_pad * out_dim)
    cost = pl.CostEstimate(flops=flops,
                           transcendentals=n_pad * out_dim,
                           bytes_accessed=bytes_accessed)
    cparams = pltpu.CompilerParams(
        dimension_semantics=("parallel",),          # >=2 grid steps -> both v7x TCs
        vmem_limit_bytes=32 * 1024 * 1024,          # explicit, portable across v5e/v6e/v7x
    )

    x_spec = pl.BlockSpec((tm, in_dim), lambda i: (i, 0))
    weight_specs = [
        pl.BlockSpec((in_dim, hid), lambda i: (0, 0)),   # W1 (resident, tiny)
        pl.BlockSpec((1, hid), lambda i: (0, 0)),        # b1
        pl.BlockSpec((hid, in_dim), lambda i: (0, 0)),   # W2
        pl.BlockSpec((1, in_dim), lambda i: (0, 0)),     # b2
    ]

    if out_dim == 1:
        out = pl.pallas_call(
            _mlp_kernel_lane_dense,
            out_shape=jax.ShapeDtypeStruct((1, n_pad), jnp.float32),
            grid_spec=pltpu.PrefetchScalarGridSpec(
                num_scalar_prefetch=0,
                grid=grid,
                in_specs=[x_spec] + weight_specs + [
                    pl.BlockSpec((1, in_dim), lambda i: (0, 0)),   # W3 as a row
                    pl.BlockSpec((1, 1), lambda i: (0, 0)),        # b3
                ],
                out_specs=pl.BlockSpec((1, tm), lambda i: (0, i)),  # lane-dense slab
            ),
            compiler_params=cparams,
            cost_estimate=cost,
        )(x, w1, b1, w2, b2, w3.T, b3)
        return out.reshape(-1)[:N]                                   # .view(-1)

    out = pl.pallas_call(
        _mlp_kernel_general,
        out_shape=jax.ShapeDtypeStruct((n_pad, out_dim), jnp.float32),
        grid_spec=pltpu.PrefetchScalarGridSpec(
            num_scalar_prefetch=0,
            grid=grid,
            in_specs=[x_spec] + weight_specs + [
                pl.BlockSpec((in_dim, out_dim), lambda i: (0, 0)),
                pl.BlockSpec((1, out_dim), lambda i: (0, 0)),
            ],
            out_specs=pl.BlockSpec((tm, out_dim), lambda i: (i, 0)),
        ),
        compiler_params=cparams,
        cost_estimate=cost,
    )(x, w1, b1, w2, b2, w3, b3)
    return out[:N].reshape(-1)                                       # .view(-1)


def xavier_uniform(key, fan_in, fan_out):
    bound = jnp.sqrt(6.0 / (fan_in + fan_out))
    # stored as [fan_in, fan_out] (transpose of PyTorch [out, in]); same distribution
    return jax.random.uniform(key, (fan_in, fan_out), jnp.float32, -bound, bound)


def linear_bias(key, fan_in, fan_out):
    # PyTorch nn.Linear default bias init: U(-1/sqrt(fan_in), 1/sqrt(fan_in))
    bound = 1.0 / jnp.sqrt(jnp.float32(fan_in))
    return jax.random.uniform(key, (1, fan_out), jnp.float32, -bound, bound)


def init_params(key, in_dim, out_dim=1):
    ks = jax.random.split(key, 6)
    w1 = xavier_uniform(ks[0], in_dim, in_dim * 2)
    b1 = linear_bias(ks[1], in_dim, in_dim * 2)
    w2 = xavier_uniform(ks[2], in_dim * 2, in_dim)
    b2 = linear_bias(ks[3], in_dim * 2, in_dim)
    w3 = xavier_uniform(ks[4], in_dim, out_dim)
    b3 = linear_bias(ks[5], in_dim, out_dim)
    return (w1, b1, w2, b2, w3, b3)


if __name__ == "__main__":
    key = jax.random.PRNGKey(0)
    k_x, k_p = jax.random.split(key)

    # Small but non-degenerate: 2 grid steps of 256 rows each.
    N, in_dim, out_dim = 512, 32, 1
    x = jax.random.normal(k_x, (N, in_dim), jnp.float32)
    params = init_params(k_p, in_dim, out_dim)

    y = jax.block_until_ready(mlp_layer(x, params))

    # reference check in plain JAX
    w1, b1, w2, b2, w3, b3 = params
    h1 = jnp.maximum(x @ w1 + b1, 0.0)
    h2 = jnp.maximum(h1 @ w2 + b2, 0.0)
    ref = jax.nn.sigmoid(h2 @ w3 + b3).reshape(-1)

    assert y.shape == (N * out_dim,)
    assert jnp.allclose(y, ref, atol=2e-5, rtol=1e-5), "mismatch vs reference"

    print("KERNEL_OK")
</pallas_src>

<mosaic_0001>
module attributes {stable_mosaic.version = 11 : i64} {
  func.func @_mlp_kernel_lane_dense(%arg0: i32, %arg1: memref<256x32xf32, #tpu.memory_space<vmem>>, %arg2: memref<32x64xf32, #tpu.memory_space<vmem>>, %arg3: memref<1x64xf32, #tpu.memory_space<vmem>>, %arg4: memref<64x32xf32, #tpu.memory_space<vmem>>, %arg5: memref<1x32xf32, #tpu.memory_space<vmem>>, %arg6: memref<1x32xf32, #tpu.memory_space<vmem>>, %arg7: memref<1x1xf32, #tpu.memory_space<vmem>>, %arg8: memref<1x256xf32, #tpu.memory_space<vmem>>) attributes {dimension_semantics = [#tpu.dimension_semantics<parallel>], iteration_bounds = array<i64: 2>, scalar_prefetch = 0 : i64, scratch_operands = 0 : i64, tpu.core_type = #tpu.core_type<tc>, window_params = [{transform_indices = @transform_0, window_bounds = array<i64: 256, 32>}, {pipeline_mode = #tpu.pipeline_mode<synchronous>, transform_indices = @transform_1, window_bounds = array<i64: 32, 64>}, {pipeline_mode = #tpu.pipeline_mode<synchronous>, transform_indices = @transform_2, window_bounds = array<i64: 1, 64>}, {pipeline_mode = #tpu.pipeline_mode<synchronous>, transform_indices = @transform_3, window_bounds = array<i64: 64, 32>}, {pipeline_mode = #tpu.pipeline_mode<synchronous>, transform_indices = @transform_4, window_bounds = array<i64: 1, 32>}, {pipeline_mode = #tpu.pipeline_mode<synchronous>, transform_indices = @transform_5, window_bounds = array<i64: 1, 32>}, {pipeline_mode = #tpu.pipeline_mode<synchronous>, transform_indices = @transform_6, window_bounds = array<i64: 1, 1>}, {transform_indices = @transform_7, window_bounds = array<i64: 1, 256>}]} {
    %c0 = arith.constant 0 : index
    %c0_0 = arith.constant 0 : index
    %0 = vector.load %arg1[%c0, %c0_0] : memref<256x32xf32, #tpu.memory_space<vmem>>, vector<256x32xf32>
    %c0_1 = arith.constant 0 : index
    %c0_2 = arith.constant 0 : index
    %1 = vector.load %arg2[%c0_1, %c0_2] : memref<32x64xf32, #tpu.memory_space<vmem>>, vector<32x64xf32>
    %cst = arith.constant dense<0.000000e+00> : vector<256x64xf32>
    %2 = tpu.matmul %0, %1, %cst {dimension_numbers = #tpu.dot_dimension_numbers<[1], [0], [0], [1], [0, 0, 1, 1], [], []>} : vector<256x32xf32>, vector<32x64xf32>, vector<256x64xf32> -> vector<256x64xf32>
    %c0_3 = arith.constant 0 : index
    %c0_4 = arith.constant 0 : index
    %3 = vector.load %arg3[%c0_3, %c0_4] : memref<1x64xf32, #tpu.memory_space<vmem>>, vector<1x64xf32>
    %4 = vector.broadcast %3 : vector<1x64xf32> to vector<256x64xf32>
    %5 = arith.addf %2, %4 : vector<256x64xf32>
    %cst_5 = arith.constant 0.000000e+00 : f32
    %6 = vector.broadcast %cst_5 : f32 to vector<256x64xf32>
    %7 = arith.maximumf %5, %6 : vector<256x64xf32>
    %c0_6 = arith.constant 0 : index
    %c0_7 = arith.constant 0 : index
    %8 = vector.load %arg4[%c0_6, %c0_7] : memref<64x32xf32, #tpu.memory_space<vmem>>, vector<64x32xf32>
    %cst_8 = arith.constant dense<0.000000e+00> : vector<256x32xf32>
    %9 = tpu.matmul %7, %8, %cst_8 {dimension_numbers = #tpu.dot_dimension_numbers<[1], [0], [0], [1], [0, 0, 1, 1], [], []>} : vector<256x64xf32>, vector<64x32xf32>, vector<256x32xf32> -> vector<256x32xf32>
    %c0_9 = arith.constant 0 : index
    %c0_10 = arith.constant 0 : index
    %10 = vector.load %arg5[%c0_9, %c0_10] : memref<1x32xf32, #tpu.memory_space<vmem>>, vector<1x32xf32>
    %11 = vector.broadcast %10 : vector<1x32xf32> to vector<256x32xf32>
    %12 = arith.addf %9, %11 : vector<256x32xf32>
    %cst_11 = arith.constant 0.000000e+00 : f32
    %13 = vector.broadcast %cst_11 : f32 to vector<256x32xf32>
    %14 = arith.maximumf %12, %13 : vector<256x32xf32>
    %c0_12 = arith.constant 0 : index
    %c0_13 = arith.constant 0 : index
    %15 = vector.load %arg6[%c0_12, %c0_13] : memref<1x32xf32, #tpu.memory_space<vmem>>, vector<1x32xf32>
    "tpu.trace_start"() <{level = 10 : i32, message = "od,nd->on"}> : () -> ()
    %cst_14 = arith.constant dense<0.000000e+00> : vector<1x256xf32>
    %16 = tpu.matmul %15, %14, %cst_14 {dimension_numbers = #tpu.dot_dimension_numbers<[1], [1], [0], [0], [0, 0, 1, 0], [], []>} : vector<1x32xf32>, vector<256x32xf32>, vector<1x256xf32> -> vector<1x256xf32>
    "tpu.trace_stop"() : () -> ()
    %c0_15 = arith.constant 0 : index
    %c0_16 = arith.constant 0 : index
    %17 = vector.load %arg7[%c0_15, %c0_16] : memref<1x1xf32, #tpu.memory_space<vmem>>, vector<1x1xf32>
    %18 = vector.broadcast %17 : vector<1x1xf32> to vector<1x256xf32>
    %19 = arith.addf %16, %18 : vector<1x256xf32>
    %20 = arith.negf %19 : vector<1x256xf32>
    %21 = math.exp %20 : vector<1x256xf32>
    %cst_17 = arith.constant 1.000000e+00 : f32
    %22 = vector.broadcast %cst_17 : f32 to vector<1x256xf32>
    %23 = arith.addf %22, %21 : vector<1x256xf32>
    %24 = arith.divf %22, %23 : vector<1x256xf32>
    %c0_18 = arith.constant 0 : index
    %c0_19 = arith.constant 0 : index
    %25 = vector.load %arg8[%c0_18, %c0_19] : memref<1x256xf32, #tpu.memory_space<vmem>>, vector<1x256xf32>
    tpu.vector_store %arg8[%c0_18, %c0_19], %24 {strides = array<i32>} : memref<1x256xf32, #tpu.memory_space<vmem>>, vector<1x256xf32>,
    return
  }
  func.func @transform_0(%arg0: i32) -> (i32, i32) {
    %c0_i32 = arith.constant 0 : i32
    %c0_i32_0 = arith.constant 0 : i32
    return %arg0, %c0_i32 : i32, i32
  }
  func.func @transform_1(%arg0: i32) -> (i32, i32) {
    %c0_i32 = arith.constant 0 : i32
    %c0_i32_0 = arith.constant 0 : i32
    %c0_i32_1 = arith.constant 0 : i32
    return %c0_i32, %c0_i32_0 : i32, i32
  }
  func.func @transform_2(%arg0: i32) -> (i32, i32) {
    %c0_i32 = arith.constant 0 : i32
    %c0_i32_0 = arith.constant 0 : i32
    %c0_i32_1 = arith.constant 0 : i32
    return %c0_i32, %c0_i32_0 : i32, i32
  }
  func.func @transform_3(%arg0: i32) -> (i32, i32) {
    %c0_i32 = arith.constant 0 : i32
    %c0_i32_0 = arith.constant 0 : i32
    %c0_i32_1 = arith.constant 0 : i32
    return %c0_i32, %c0_i32_0 : i32, i32
  }
  func.func @transform_4(%arg0: i32) -> (i32, i32) {
    %c0_i32 = arith.constant 0 : i32
    %c0_i32_0 = arith.constant 0 : i32
    %c0_i32_1 = arith.constant 0 : i32
    return %c0_i32, %c0_i32_0 : i32, i32
  }
  func.func @transform_5(%arg0: i32) -> (i32, i32) {
    %c0_i32 = arith.constant 0 : i32
    %c0_i32_0 = arith.constant 0 : i32
    %c0_i32_1 = arith.constant 0 : i32
    return %c0_i32, %c0_i32_0 : i32, i32
  }
  func.func @transform_6(%arg0: i32) -> (i32, i32) {
    %c0_i32 = arith.constant 0 : i32
    %c0_i32_0 = arith.constant 0 : i32
    %c0_i32_1 = arith.constant 0 : i32
    return %c0_i32, %c0_i32_0 : i32, i32
  }
  func.func @transform_7(%arg0: i32) -> (i32, i32) {
    %c0_i32 = arith.constant 0 : i32
    %c0_i32_0 = arith.constant 0 : i32
    return %c0_i32, %arg0 : i32, i32
  }
}

</mosaic_0001>

<bundles_post_ra>
// kernel: tpu_custom_call.1
= control target key start
LH: loop header
LB: loop body
LE: loop exit
PB: predicated region body
PF: predicated region fallthrough
CT: control target
= control target key end

     0   :  { %s1755_s0 = inlined_call_operand.vmem [shape: f32[512,32], index: 0, kind: input, shape index: {}]   ;;  %s1756_s1 = inlined_call_operand.vmem [shape: f32[32,64], index: 1, kind: input, shape index: {}]   ;;  %s1757_s2 = inlined_call_operand.vmem [shape: f32[1,64], index: 2, kind: input, shape index: {}]   ;;  %s1758_s3 = inlined_call_operand.vmem [shape: f32[64,32], index: 3, kind: input, shape index: {}]   ;;  %s1759_s4 = inlined_call_operand.vmem [shape: f32[1,32], index: 4, kind: input, shape index: {}]   ;;  %s1760_s5 = inlined_call_operand.vmem [shape: f32[1,32], index: 5, kind: input, shape index: {}]   ;;  %s1761_s6 = inlined_call_operand.<no memory space> [shape: f32[1,1], index: 6, kind: input, shape index: {}]   ;;  %s1762_s7 = inlined_call_operand.hbm [shape: f32[1,512], index: 7, kind: output, shape index: {}]  }
   0x1   :  { %v12_v0 = vstv %s1761_s6 }
   0x2   :  { %13 = vst [vmem:[#allocation2] sm:$0x1] %v12_v0 }
   0x3   :  { %14 = vsyncpa [#allocation4], 0 }
   0x4   :  { %16 = vsyncpa [#allocation4 + $0x1], 0  ;;  %s1371_s26 = smov 0   ;;  %s1373_s27 = smov 0  }
   0x5   :  { %s1375_s28 = smov 0   ;;  %s1377_s29 = smov 0  }
   0x6 LB: > { %s1392_s6 = sadd.s32 4294967295, %s1325_s29   ;;  %s1089_s30 = sadd.s32 4294967294, %s1325_s29   ;;  %s1325_s29 = sphi %s1377_s29, %s1770_s29   ;;  %s1321_s28 = sphi %s1375_s28, %s1769_s28   ;;  %s1317_s27 = sphi %s1373_s27, %s1768_s27   ;;  %s1313_s26 = sphi %s1371_s26, %s1767_s26  }
   0x7   : > { %s1396_s8 = sadd.s32 1, %s1325_s29   ;;  %s181_s9 = sadd.s32 1, %s1321_s28 }
   0x8   : > { %s178_s10 = ssub.s32 %s1325_s29, %s1396_s8  ;;  %p191_p0 = scmp.ne.s32.totalorder %s1321_s28, %s1317_s27 }
   0x9   : > { %p179_p1 = scmp.eq.s32.totalorder %s178_s10, 0  ;;  %p192_p2 = scmp.eq.s32.totalorder %s1392_s6, 1 }
   0xa   : > { %p197_p3 = scmp.ne.s32.totalorder %s1317_s27, %s1313_s26  ;;  %p198_p4 = scmp.eq.s32.totalorder %s1089_s30, 1 }
   0xb   : > { %s1407_s11 = scalar_select %p179_p1, %s1321_s28, %s181_s9  }
   0xc   : > { %p1409_p5 = por %p192_p2, %p191_p0  ;;  %p1413_p6 = por %p198_p4, %p197_p3 }
   0xd   : > { %p1092_p7 = scmp.ge.s32.totalorder %s1325_s29, 1  ;;  %p243_p8 = scmp.lt.s32.totalorder %s1325_s29, 3 }
   0xf   : > { %p244_p9 = pnand %p1092_p7, %p243_p8 }
  0x10   : > { %s1094_s18 = sshll.u32 (!%p244_p9), %s1392_s6, 5  ;;  %s272_s19 = sand.u32 (!%p244_p9), 1, %s1317_s27  }
  0x11   : > { %247 = sbr.rel (%p244_p9) target bundleno = 645 (0x285), region = 48  ;;  %p276_p10 = scmp.lt.s32.totalorder (!%p244_p9), %s1094_s18, 63 }
  0x12   : > { %s1713_s20 = sshll.u32 (!%p244_p9), %s272_s19, 1  ;;  %s1197_s21 = sshll.u32 (!%p244_p9), %s1392_s6, 1 }
  0x13   : > { %s1025_s24 = scalar_lea.hbm (!%p244_p9), %s1762_s7, %s1197_s21  ;;  %s274_s6 = scalar_lea.vmem (!%p244_p9), [#allocation3], %s1713_s20 }
  0x14   : > { %s1027_s25 = sshll.u32 (!%p244_p9), %s274_s6, 4  ;;  %s1029_s9 = sshll.u32 (!%p244_p9), %s1025_s24, 4  ;;  %s1028_s25 = int_to_ptr.vmem [resolvable:$true] %s1027_s25  ;;  %s1030_s9 = int_to_ptr.hbm [resolvable:$true] %s1029_s9 }
  0x15   : > { %s1015_s10 = scalar_lea.sflag (!%p244_p9), [#allocation4], %s272_s19  ;;  %s1277_s14 = sshra.s32 (!%p244_p9), %s1030_s9, 4  ;;  %s1278_s14 = int_to_ptr.hbm [resolvable:$true] %s1277_s14 }
  0x16   : > { %v317_v1 = vld [vmem:[%s1756_s1 + $0x18] sm:$0xff]  ;;  %v316_v2 = vld [vmem:[%s1756_s1 + $0x10] sm:$0xff]  ;;  %v315_v3 = vld [vmem:[%s1756_s1 + $0x8] sm:$0xff]  ;;  %s1772_s18 = smov (!%p276_p10, %s1094_s18), 63  ;;  %vm322_vm0 = vcmask 261120   ;;  %vm576_vm1 = vcmask 523264   ;;  %p1284_p0 = scmp.lt.s32.totalorder %s1278_s14, %s1762_s7 }
  0x17   : > { %431 = vmatpush.msra.mxu0 %v317_v1  ;;  %1200 = vmatpush.msra.mxu3 %v317_v1  ;;  %v314_v4 = vld [vmem:[%s1756_s1] sm:$0xff]  ;;  %s1095_s23 = sshll.u32 %s1772_s18, 3  ;;  %v571_v27 = vld [vmem:[%s1758_s3 + $0x38] sm:$0xff]  ;;  %v570_v28 = vld [vmem:[%s1758_s3 + $0x30] sm:$0xff]  ;;  %vm1006_vm9 = vcmask 1040384   ;;  %s1279_s15 = scalar_lea.hbm %s1278_s14, 2 }
  0x18   : > { %s1435_s30 = scalar_lea.vmem %s1755_s0, %s1095_s23  ;;  %681 = vmatpush.msra.mxu1 %v571_v27  ;;  %1204 = vmatpush.msra.mxu2 %v571_v27  ;;  %v569_v29 = vld [vmem:[%s1758_s3 + $0x28] sm:$0xff]  ;;  %v568_v32 = vld [vmem:[%s1758_s3 + $0x20] sm:$0xff]  ;;  %v567_v33 = vld [vmem:[%s1758_s3 + $0x18] sm:$0xff]  ;;  %p1280_p11 = scmp.ne.s32.totalorder %s1278_s14, %s1279_s15 }
  0x19   : > { %432 = vmatpush.msra.mxu0 %v316_v2  ;;  %1201 = vmatpush.msra.mxu3 %v316_v2  ;;  %v282_v5 = vld [vmem:[%s1435_s30] sm:$0xff]  ;;  %v299_v6 = vld [vmem:[%s1435_s30 + $0x88] sm:$0xff]  ;;  %v300_v8 = vld [vmem:[%s1435_s30 + $0x90] sm:$0xff]  ;;  %s1283_s17 = scalar_lea.hbm %s1762_s7, 4 }
  0x1a   : > { %v283_v7 = vld [vmem:[%s1435_s30 + $0x8] sm:$0xff]  ;;  %v284_v9 = vld [vmem:[%s1435_s30 + $0x10] sm:$0xff]  ;;  %v301_v10 = vld [vmem:[%s1435_s30 + $0x98] sm:$0xff]  ;;  %682 = vmatpush.msra.mxu1 %v570_v28  ;;  %1205 = vmatpush.msra.mxu2 %v570_v28  ;;  %p1281_p12 = pnand %p1280_p11, %p1409_p5  ;;  %p1285_p1 = scmp.lt.s32.totalorder %s1283_s17, %s1279_s15 }
  0x1b   : > { %433 = vmatpush.msra.mxu0 %v315_v3  ;;  %1202 = vmatpush.msra.mxu3 %v315_v3  ;;  %v285_v11 = vld [vmem:[%s1435_s30 + $0x18] sm:$0xff]  ;;  %v302_v12 = vld [vmem:[%s1435_s30 + $0xa0] sm:$0xff]  ;;  %v303_v14 = vld [vmem:[%s1435_s30 + $0xa8] sm:$0xff] }
  0x1c   : > { %v286_v13 = vld [vmem:[%s1435_s30 + $0x20] sm:$0xff]  ;;  %v287_v15 = vld [vmem:[%s1435_s30 + $0x28] sm:$0xff]  ;;  %v304_v16 = vld [vmem:[%s1435_s30 + $0xb0] sm:$0xff]  ;;  %683 = vmatpush.msra.mxu1 %v569_v29  ;;  %1206 = vmatpush.msra.mxu2 %v569_v29  ;;  %p1282_p13 = pneg %p1281_p12  ;;  %p1286_p2 = por %p1285_p1, %p1284_p0 }
  0x1d   : > { %434 = vmatpush.msra.mxu0 %v314_v4  ;;  %1203 = vmatpush.msra.mxu3 %v314_v4  ;;  %v288_v17 = vld [vmem:[%s1435_s30 + $0x30] sm:$0xff]  ;;  %v305_v18 = vld [vmem:[%s1435_s30 + $0xb8] sm:$0xff]  ;;  %v306_v20 = vld [vmem:[%s1435_s30 + $0xc0] sm:$0xff] }
  0x1e   : > { %1096 = vmatmul.msk.f32.vlgmr.msra.gmra.mxu0 %vm322_vm0, %v282_v5  ;;  %1113 = vmatmul.msk.f32.vlgmr.msra.gmra.mxu3 %vm322_vm0, %v299_v6  ;;  %v289_v19 = vld [vmem:[%s1435_s30 + $0x38] sm:$0xff]  ;;  %v290_v21 = vld [vmem:[%s1435_s30 + $0x40] sm:$0xff]  ;;  %v307_v22 = vld [vmem:[%s1435_s30 + $0xc8] sm:$0xff]  ;;  %p1287_p3 = pnand %p1286_p2, %p1282_p13 }
  0x1f   : > { %v291_v23 = vld [vmem:[%s1435_s30 + $0x48] sm:$0xff]  ;;  %v308_v24 = vld [vmem:[%s1435_s30 + $0xd0] sm:$0xff]  ;;  %v309_v26 = vld [vmem:[%s1435_s30 + $0xd8] sm:$0xff]  ;;  %684 = vmatpush.msra.mxu1 %v568_v32  ;;  %1207 = vmatpush.msra.mxu2 %v568_v32 }
  0x20   : > { %v292_v25 = vld [vmem:[%s1435_s30 + $0x50] sm:$0xff]  ;;  %v293_v30 = vld [vmem:[%s1435_s30 + $0x58] sm:$0xff]  ;;  %v310_v31 = vld [vmem:[%s1435_s30 + $0xe0] sm:$0xff] }
  0x21   : > { %685 = vmatpush.msra.mxu1 %v567_v33  ;;  %1208 = vmatpush.msra.mxu2 %v567_v33  ;;  %v566_v34 = vld [vmem:[%s1758_s3 + $0x10] sm:$0xff]  ;;  %v294_v35 = vld [vmem:[%s1435_s30 + $0x60] sm:$0xff]  ;;  %v311_v36 = vld [vmem:[%s1435_s30 + $0xe8] sm:$0xff] }
  0x22   : > { %v565_v37 = vld [vmem:[%s1758_s3 + $0x8] sm:$0xff]  ;;  %v564_v38 = vld [vmem:[%s1758_s3] sm:$0xff]  ;;  %v312_v40 = vld [vmem:[%s1435_s30 + $0xf0] sm:$0xff] }
  0x23   : > { %686 = vmatpush.msra.mxu1 %v566_v34  ;;  %1209 = vmatpush.msra.mxu2 %v566_v34  ;;  %v295_v39 = vld [vmem:[%s1435_s30 + $0x68] sm:$0xff]  ;;  %v296_v41 = vld [vmem:[%s1435_s30 + $0x70] sm:$0xff]  ;;  %v313_v42 = vld [vmem:[%s1435_s30 + $0xf8] sm:$0xff] }
  0x24   : > { %v297_v43 = vld [vmem:[%s1435_s30 + $0x78] sm:$0xff]  ;;  %v1526_v44 = vld [vmem:[%s1757_s2] ss:$0 sm:$0xff] }
  0x25   : > { %687 = vmatpush.msra.mxu1 %v565_v37  ;;  %1210 = vmatpush.msra.mxu2 %v565_v37  ;;  %v298_v46 = vld [vmem:[%s1435_s30 + $0x80] sm:$0xff] }
  0x26   : > { %1097 = vmatmul.msk.f32.gmra.mxu0 %vm322_vm0, %v283_v7  ;;  %1114 = vmatmul.msk.f32.gmra.mxu3 %vm322_vm0, %v300_v8 }
  0x27   : > { %688 = vmatpush.msra.mxu1 %v564_v38  ;;  %1211 = vmatpush.msra.mxu2 %v564_v38 }
  0x2e   : > { %1098 = vmatmul.msk.f32.gmra.mxu0 %vm322_vm0, %v284_v9  ;;  %1115 = vmatmul.msk.f32.gmra.mxu3 %vm322_vm0, %v301_v10 }
  0x36   : > { %1099 = vmatmul.msk.f32.gmra.mxu0 %vm322_vm0, %v285_v11  ;;  %1116 = vmatmul.msk.f32.gmra.mxu3 %vm322_vm0, %v302_v12 }
  0x3e   : > { %1100 = vmatmul.msk.f32.gmra.mxu0 %vm322_vm0, %v286_v13  ;;  %1117 = vmatmul.msk.f32.gmra.mxu3 %vm322_vm0, %v303_v14 }
  0x46   : > { %1101 = vmatmul.msk.f32.gmra.mxu0 %vm322_vm0, %v287_v15  ;;  %1118 = vmatmul.msk.f32.gmra.mxu3 %vm322_vm0, %v304_v16 }
  0x4e   : > { %1102 = vmatmul.msk.f32.gmra.mxu0 %vm322_vm0, %v288_v17  ;;  %1119 = vmatmul.msk.f32.gmra.mxu3 %vm322_vm0, %v305_v18 }
  0x56   : > { %1103 = vmatmul.msk.f32.gmra.mxu0 %vm322_vm0, %v289_v19  ;;  %1120 = vmatmul.msk.f32.gmra.mxu3 %vm322_vm0, %v306_v20 }
  0x5e   : > { %1104 = vmatmul.msk.f32.gmra.mxu0 %vm322_vm0, %v290_v21  ;;  %1121 = vmatmul.msk.f32.gmra.mxu3 %vm322_vm0, %v307_v22 }
  0x66   : > { %1105 = vmatmul.msk.f32.gmra.mxu0 %vm322_vm0, %v291_v23  ;;  %1122 = vmatmul.msk.f32.gmra.mxu3 %vm322_vm0, %v308_v24 }
  0x6e   : > { %1106 = vmatmul.msk.f32.gmra.mxu0 %vm322_vm0, %v292_v25  ;;  %1123 = vmatmul.msk.f32.gmra.mxu3 %vm322_vm0, %v309_v26 }
  0x76   : > { %1107 = vmatmul.msk.f32.gmra.mxu0 %vm322_vm0, %v293_v30  ;;  %1124 = vmatmul.msk.f32.gmra.mxu3 %vm322_vm0, %v310_v31 }
  0x7e   : > { %1108 = vmatmul.msk.f32.gmra.mxu0 %vm322_vm0, %v294_v35  ;;  %1125 = vmatmul.msk.f32.gmra.mxu3 %vm322_vm0, %v311_v36 }
  0x86   : > { %1109 = vmatmul.msk.f32.gmra.mxu0 %vm322_vm0, %v295_v39  ;;  %1126 = vmatmul.msk.f32.gmra.mxu3 %vm322_vm0, %v312_v40 }
  0x8e   : > { %1110 = vmatmul.msk.f32.gmra.mxu0 %vm322_vm0, %v296_v41  ;;  %1127 = vmatmul.msk.f32.gmra.mxu3 %vm322_vm0, %v313_v42 }
  0x96   : > { %1111 = vmatmul.msk.f32.gmra.mxu0 %vm322_vm0, %v297_v43 }
  0x9b   : > { %v436_v45 = vpop.f32.mrf.mxu0 }
  0x9c   : > { %v437_v47 = vadd.f32 %v1526_v44, %v436_v45 }
  0x9e   : > { %v532_v48 = vmax.f32 %v437_v47, 0.0  ;;  %1112 = vmatmul.msk.f32.gmra.mxu0 %vm322_vm0, %v298_v46 }
  0xa0   : > { %1128 = vmatmul.msk.f32.vlgmr.msra.gmra.mxu1 %vm576_vm1, %v532_v48 }
  0xa1   : > { %v1532_v49 = vpop.f32.mrf.mxu3 }
  0xa3   : > { %v439_v50 = vpop.f32.mrf.mxu0 }
  0xa4   : > { %v440_v51 = vadd.f32 %v1526_v44, %v439_v50 }
  0xa6   : > { %v533_v52 = vmax.f32 %v440_v51, 0.0 }
  0xa8   : > { %1129 = vmatmul.msk.f32.gmra.mxu1 %vm576_vm1, %v533_v52 }
  0xa9   : > { %v490_v53 = vpop.f32.mrf.mxu3 }
  0xaa   : > { %v491_v54 = vadd.f32 %v1526_v44, %v490_v53 }
  0xab   : > { %v442_v55 = vpop.f32.mrf.mxu0 }
  0xac   : > { %v550_v56 = vmax.f32 %v491_v54, 0.0  ;;  %v443_v57 = vadd.f32 %v1526_v44, %v442_v55 }
  0xae   : > { %v534_v58 = vmax.f32 %v443_v57, 0.0  ;;  %1146 = vmatmul.msk.f32.vlgmr.msra.gmra.mxu2 %vm576_vm1, %v550_v56 }
  0xb0   : > { %1130 = vmatmul.msk.f32.gmra.mxu1 %vm576_vm1, %v534_v58 }
  0xb1   : > { %v493_v59 = vpop.f32.mrf.mxu3 }
  0xb2   : > { %v494_v60 = vadd.f32 %v1526_v44, %v493_v59 }
  0xb3   : > { %v445_v61 = vpop.f32.mrf.mxu0 }
  0xb4   : > { %v551_v62 = vmax.f32 %v494_v60, 0.0  ;;  %v446_v63 = vadd.f32 %v1526_v44, %v445_v61 }
  0xb6   : > { %v535_v0 = vmax.f32 %v446_v63, 0.0  ;;  %1147 = vmatmul.msk.f32.gmra.mxu2 %vm576_vm1, %v551_v62 }
  0xb8   : > { %1131 = vmatmul.msk.f32.gmra.mxu1 %vm576_vm1, %v535_v0 }
  0xb9   : > { %v496_v1 = vpop.f32.mrf.mxu3 }
  0xba   : > { %v497_v2 = vadd.f32 %v1526_v44, %v496_v1 }
  0xbb   : > { %v448_v3 = vpop.f32.mrf.mxu0 }
  0xbc   : > { %v552_v4 = vmax.f32 %v497_v2, 0.0  ;;  %v449_v5 = vadd.f32 %v1526_v44, %v448_v3 }
  0xbe   : > { %v536_v6 = vmax.f32 %v449_v5, 0.0  ;;  %1148 = vmatmul.msk.f32.gmra.mxu2 %vm576_vm1, %v552_v4 }
  0xc0   : > { %1132 = vmatmul.msk.f32.gmra.mxu1 %vm576_vm1, %v536_v6 }
  0xc1   : > { %v499_v7 = vpop.f32.mrf.mxu3 }
  0xc2   : > { %v500_v8 = vadd.f32 %v1526_v44, %v499_v7 }
  0xc3   : > { %v451_v9 = vpop.f32.mrf.mxu0 }
  0xc4   : > { %v553_v10 = vmax.f32 %v500_v8, 0.0  ;;  %v452_v11 = vadd.f32 %v1526_v44, %v451_v9 }
  0xc6   : > { %v537_v12 = vmax.f32 %v452_v11, 0.0  ;;  %1149 = vmatmul.msk.f32.gmra.mxu2 %vm576_vm1, %v553_v10 }
  0xc8   : > { %1133 = vmatmul.msk.f32.gmra.mxu1 %vm576_vm1, %v537_v12 }
  0xc9   : > { %v502_v13 = vpop.f32.mrf.mxu3 }
  0xca   : > { %v503_v14 = vadd.f32 %v1526_v44, %v502_v13 }
  0xcb   : > { %v454_v15 = vpop.f32.mrf.mxu0 }
  0xcc   : > { %v554_v16 = vmax.f32 %v503_v14, 0.0  ;;  %v455_v17 = vadd.f32 %v1526_v44, %v454_v15  ;;  %v488_v15 = vadd.f32 %v1526_v44, %v1532_v49 }
  0xce   : > { %v538_v18 = vmax.f32 %v455_v17, 0.0  ;;  %1150 = vmatmul.msk.f32.gmra.mxu2 %vm576_vm1, %v554_v16  ;;  %v549_v17 = vmax.f32 %v488_v15, 0.0 }
  0xd0   : > { %1134 = vmatmul.msk.f32.gmra.mxu1 %vm576_vm1, %v538_v18 }
  0xd1   : > { %v505_v19 = vpop.f32.mrf.mxu3 }
  0xd2   : > { %v506_v20 = vadd.f32 %v1526_v44, %v505_v19 }
  0xd3   : > { %v457_v21 = vpop.f32.mrf.mxu0 }
  0xd4   : > { %v555_v22 = vmax.f32 %v506_v20, 0.0  ;;  %v458_v23 = vadd.f32 %v1526_v44, %v457_v21 }
  0xd6   : > { %v539_v24 = vmax.f32 %v458_v23, 0.0  ;;  %1151 = vmatmul.msk.f32.gmra.mxu2 %vm576_vm1, %v555_v22 }
  0xd8   : > { %1135 = vmatmul.msk.f32.gmra.mxu1 %vm576_vm1, %v539_v24 }
  0xd9   : > { %v508_v25 = vpop.f32.mrf.mxu3 }
  0xda   : > { %v509_v26 = vadd.f32 %v1526_v44, %v508_v25 }
  0xdb   : > { %v460_v27 = vpop.f32.mrf.mxu0 }
  0xdc   : > { %v556_v28 = vmax.f32 %v509_v26, 0.0  ;;  %v461_v29 = vadd.f32 %v1526_v44, %v460_v27 }
  0xde   : > { %v540_v30 = vmax.f32 %v461_v29, 0.0  ;;  %1152 = vmatmul.msk.f32.gmra.mxu2 %vm576_vm1, %v556_v28 }
  0xe0   : > { %1136 = vmatmul.msk.f32.gmra.mxu1 %vm576_vm1, %v540_v30 }
  0xe1   : > { %v511_v31 = vpop.f32.mrf.mxu3 }
  0xe2   : > { %v512_v32 = vadd.f32 %v1526_v44, %v511_v31 }
  0xe3   : > { %v463_v33 = vpop.f32.mrf.mxu0 }
  0xe4   : > { %v557_v34 = vmax.f32 %v512_v32, 0.0  ;;  %v464_v35 = vadd.f32 %v1526_v44, %v463_v33 }
  0xe6   : > { %v541_v36 = vmax.f32 %v464_v35, 0.0  ;;  %1153 = vmatmul.msk.f32.gmra.mxu2 %vm576_vm1, %v557_v34 }
  0xe8   : > { %1137 = vmatmul.msk.f32.gmra.mxu1 %vm576_vm1, %v541_v36 }
  0xe9   : > { %v514_v37 = vpop.f32.mrf.mxu3 }
  0xea   : > { %v515_v38 = vadd.f32 %v1526_v44, %v514_v37 }
  0xeb   : > { %v466_v39 = vpop.f32.mrf.mxu0 }
  0xec   : > { %v558_v40 = vmax.f32 %v515_v38, 0.0  ;;  %v467_v41 = vadd.f32 %v1526_v44, %v466_v39 }
  0xee   : > { %v542_v42 = vmax.f32 %v467_v41, 0.0  ;;  %1154 = vmatmul.msk.f32.gmra.mxu2 %vm576_vm1, %v558_v40 }
  0xf0   : > { %1138 = vmatmul.msk.f32.gmra.mxu1 %vm576_vm1, %v542_v42  ;;  %v1626_v42 = vld [vmem:[%s1759_s4] ss:$0 sm:$0xff] }
  0xf1   : > { %v517_v43 = vpop.f32.mrf.mxu3 }
  0xf2   : > { %v518_v45 = vadd.f32 %v1526_v44, %v517_v43 }
  0xf3   : > { %v469_v46 = vpop.f32.mrf.mxu0 }
  0xf4   : > { %v559_v47 = vmax.f32 %v518_v45, 0.0  ;;  %v470_v48 = vadd.f32 %v1526_v44, %v469_v46 }
  0xf6   : > { %v543_v50 = vmax.f32 %v470_v48, 0.0  ;;  %1155 = vmatmul.msk.f32.gmra.mxu2 %vm576_vm1, %v559_v47 }
  0xf8   : > { %1139 = vmatmul.msk.f32.gmra.mxu1 %vm576_vm1, %v543_v50 }
  0xf9   : > { %v520_v51 = vpop.f32.mrf.mxu3 }
  0xfa   : > { %v521_v52 = vadd.f32 %v1526_v44, %v520_v51 }
  0xfb   : > { %v472_v53 = vpop.f32.mrf.mxu0 }
  0xfc   : > { %v560_v54 = vmax.f32 %v521_v52, 0.0  ;;  %v473_v55 = vadd.f32 %v1526_v44, %v472_v53 }
  0xfe   : > { %v544_v56 = vmax.f32 %v473_v55, 0.0  ;;  %1156 = vmatmul.msk.f32.gmra.mxu2 %vm576_vm1, %v560_v54 }
 0x100   : > { %1140 = vmatmul.msk.f32.gmra.mxu1 %vm576_vm1, %v544_v56 }
 0x101   : > { %v523_v57 = vpop.f32.mrf.mxu3 }
 0x102   : > { %v524_v58 = vadd.f32 %v1526_v44, %v523_v57 }
 0x103   : > { %v475_v59 = vpop.f32.mrf.mxu0 }
 0x104   : > { %v561_v60 = vmax.f32 %v524_v58, 0.0  ;;  %v476_v61 = vadd.f32 %v1526_v44, %v475_v59 }
 0x106   : > { %v545_v62 = vmax.f32 %v476_v61, 0.0  ;;  %1157 = vmatmul.msk.f32.gmra.mxu2 %vm576_vm1, %v561_v60 }
 0x108   : > { %1141 = vmatmul.msk.f32.gmra.mxu1 %vm576_vm1, %v545_v62 }
 0x109   : > { %v526_v63 = vpop.f32.mrf.mxu3 }
 0x10a   : > { %v527_v0 = vadd.f32 %v1526_v44, %v526_v63 }
 0x10b   : > { %v478_v1 = vpop.f32.mrf.mxu0 }
 0x10c   : > { %v562_v2 = vmax.f32 %v527_v0, 0.0  ;;  %v479_v3 = vadd.f32 %v1526_v44, %v478_v1 }
 0x10e   : > { %v546_v4 = vmax.f32 %v479_v3, 0.0  ;;  %1158 = vmatmul.msk.f32.gmra.mxu2 %vm576_vm1, %v562_v2 }
 0x110   : > { %1142 = vmatmul.msk.f32.gmra.mxu1 %vm576_vm1, %v546_v4 }
 0x111   : > { %v529_v5 = vpop.f32.mrf.mxu3 }
 0x112   : > { %v530_v6 = vadd.f32 %v1526_v44, %v529_v5 }
 0x113   : > { %v481_v7 = vpop.f32.mrf.mxu0 }
 0x114   : > { %v563_v8 = vmax.f32 %v530_v6, 0.0  ;;  %v482_v9 = vadd.f32 %v1526_v44, %v481_v7 }
 0x116   : > { %v547_v10 = vmax.f32 %v482_v9, 0.0  ;;  %1159 = vmatmul.msk.f32.gmra.mxu2 %vm576_vm1, %v563_v8 }
 0x118   : > { %1143 = vmatmul.msk.f32.gmra.mxu1 %vm576_vm1, %v547_v10 }
 0x11b   : > { %v484_v11 = vpop.f32.mrf.mxu0 }
 0x11c   : > { %v485_v12 = vadd.f32 %v1526_v44, %v484_v11 }
 0x11d   : > { %v1593_v13 = vpop.f32.mrf.mxu1 }
 0x11e   : > { %v548_v14 = vmax.f32 %v485_v12, 0.0 }
 0x120   : > { %1144 = vmatmul.msk.f32.gmra.mxu1 %vm576_vm1, %v548_v14 }
 0x125   : > { %v1598_v16 = vpop.f32.mrf.mxu1 }
 0x128   : > { %1145 = vmatmul.msk.f32.gmra.mxu1 %vm576_vm1, %v549_v17 }
 0x12d   : > { %v1601_v18 = vpop.f32.mrf.mxu1 }
 0x131   : > { %v1603_v19 = vpop.f32.mrf.mxu2 }
 0x135   : > { %v1605_v20 = vpop.f32.mrf.mxu1 }
 0x139   : > { %v1607_v21 = vpop.f32.mrf.mxu2 }
 0x13d   : > { %v1609_v22 = vpop.f32.mrf.mxu1 }
 0x141   : > { %v1611_v23 = vpop.f32.mrf.mxu2 }
 0x145   : > { %v1613_v24 = vpop.f32.mrf.mxu1 }
 0x149   : > { %v1615_v44 = vpop.f32.mrf.mxu2 }
 0x14d   : > { %v1617_v49 = vpop.f32.mrf.mxu1 }
 0x14e   : > { %v709_v17 = vadd.f32 %v1626_v42, %v1617_v49  ;;  %v1327_v49 = vmov 0  }
 0x14f   : > { %1252 = vset.pattern.permute.xlu0 %v1327_v49 }
 0x151   : > { %v1619_v25 = vpop.f32.mrf.mxu2 }
 0x155   : > { %v711_v26 = vpop.f32.mrf.mxu1 }
 0x156   : > { %v712_v11 = vadd.f32 %v1626_v42, %v711_v26  ;;  %v706_v26 = vadd.f32 %v1626_v42, %v1613_v24 }
 0x159   : > { %v1621_v27 = vpop.f32.mrf.mxu2 }
 0x15d   : > { %v714_v28 = vpop.f32.mrf.mxu1 }
 0x15e   : > { %v715_v7 = vadd.f32 %v1626_v42, %v714_v28  ;;  %v793_v28 = vmax.f32 %v712_v11, 0.0 }
 0x160   : > { %v794_v12 = vmax.f32 %v715_v7, 0.0 }
 0x161   : > { %v762_v29 = vpop.f32.mrf.mxu2 }
 0x162   : > { %v763_v14 = vadd.f32 %v1626_v42, %v762_v29  ;;  %v792_v29 = vmax.f32 %v709_v17, 0.0  ;;  %v1009_v17 = vlaneseq }
 0x164   : > { %vm1011_vm11 = vcmp.lt.s32.totalorder %v1009_v17, 256 }
 0x165   : > { %v717_v30 = vpop.f32.mrf.mxu1 }
 0x166   : > { %v718_v3 = vadd.f32 %v1626_v42, %v717_v30  ;;  %v760_v30 = vadd.f32 %v1626_v42, %v1621_v27  ;;  %v703_v27 = vadd.f32 %v1626_v42, %v1609_v22  ;;  %v697_v22 = vadd.f32 %v1626_v42, %v1601_v18 }
 0x167   : > { %v691_v18 = vadd.f32 %v1626_v42, %v1593_v13  ;;  %v818_v13 = vld [vmem:[%s1760_s5] sm:$0x1] }
 0x168   : > { %v795_v8 = vmax.f32 %v718_v3, 0.0 }
 0x169   : > { %v765_v31 = vpop.f32.mrf.mxu2 }
 0x16a   : > { %v766_v9 = vadd.f32 %v1626_v42, %v765_v31  ;;  %v810_v31 = vmax.f32 %v763_v14, 0.0 }
 0x16c   : > { %v811_v15 = vmax.f32 %v766_v9, 0.0 }
 0x16d   : > { %v720_v32 = vpop.f32.mrf.mxu1 }
 0x16e   : > { %v721_v63 = vadd.f32 %v1626_v42, %v720_v32  ;;  %v757_v32 = vadd.f32 %v1626_v42, %v1619_v25 }
 0x170   : > { %v796_v4 = vmax.f32 %v721_v63, 0.0  ;;  %v808_v24 = vmax.f32 %v757_v32, 0.0 }
 0x171   : > { %v768_v33 = vpop.f32.mrf.mxu2 }
 0x172   : > { %v769_v5 = vadd.f32 %v1626_v42, %v768_v33  ;;  %v809_v33 = vmax.f32 %v760_v30, 0.0 }
 0x174   : > { %v812_v10 = vmax.f32 %v769_v5, 0.0 }
 0x175   : > { %v723_v34 = vpop.f32.mrf.mxu1 }
 0x176   : > { %v724_v59 = vadd.f32 %v1626_v42, %v723_v34  ;;  %v819_v34 = vld [vmem:[#allocation2] sm:$0x1] }
 0x177   : > { %822 = vperm.xlu0 %1252, %v819_v34  }
 0x178   : > { %v797_v0 = vmax.f32 %v724_v59, 0.0 }
 0x179   : > { %v771_v35 = vpop.f32.mrf.mxu2 }
 0x17a   : > { %v772_v1 = vadd.f32 %v1626_v42, %v771_v35  ;;  %v791_v35 = vmax.f32 %v706_v26, 0.0 }
 0x17c   : > { %v813_v6 = vmax.f32 %v772_v1, 0.0 }
 0x17d   : > { %v726_v36 = vpop.f32.mrf.mxu1 }
 0x17e   : > { %v727_v55 = vadd.f32 %v1626_v42, %v726_v36  ;;  %v754_v36 = vadd.f32 %v1626_v42, %v1615_v44 }
 0x180   : > { %v798_v60 = vmax.f32 %v727_v55, 0.0 }
 0x181   : > { %v774_v37 = vpop.f32.mrf.mxu2 }
 0x182   : > { %v775_v61 = vadd.f32 %v1626_v42, %v774_v37  ;;  %v700_v37 = vadd.f32 %v1626_v42, %v1605_v20  ;;  %v694_v20 = vadd.f32 %v1626_v42, %v1598_v16  ;;  %v786_v16 = vmax.f32 %v691_v18, 0.0 }
 0x184   : > { %v814_v2 = vmax.f32 %v775_v61, 0.0  ;;  %v789_v44 = vmax.f32 %v700_v37, 0.0 }
 0x185   : > { %v729_v38 = vpop.f32.mrf.mxu1 }
 0x186   : > { %v730_v51 = vadd.f32 %v1626_v42, %v729_v38  ;;  %v790_v38 = vmax.f32 %v703_v27, 0.0 }
 0x188   : > { %v799_v56 = vmax.f32 %v730_v51, 0.0 }
 0x189   : > { %v777_v39 = vpop.f32.mrf.mxu2 }
 0x18a   : > { %v778_v57 = vadd.f32 %v1626_v42, %v777_v39  ;;  %v751_v39 = vadd.f32 %v1626_v42, %v1611_v23  ;;  %v788_v23 = vmax.f32 %v697_v22, 0.0 }
 0x18c   : > { %v815_v62 = vmax.f32 %v778_v57, 0.0 }
 0x18d   : > { %v732_v40 = vpop.f32.mrf.mxu1 }
 0x18e   : > { %v733_v46 = vadd.f32 %v1626_v42, %v732_v40  ;;  %v807_v40 = vmax.f32 %v754_v36, 0.0 }
 0x190   : > { %v800_v52 = vmax.f32 %v733_v46, 0.0 }
 0x191   : > { %v780_v41 = vpop.f32.mrf.mxu2 }
 0x192   : > { %v781_v53 = vadd.f32 %v1626_v42, %v780_v41  ;;  %v748_v41 = vadd.f32 %v1626_v42, %v1607_v21  ;;  %v787_v21 = vmax.f32 %v694_v20, 0.0 }
 0x194   : > { %v816_v58 = vmax.f32 %v781_v53, 0.0  ;;  %v805_v46 = vmax.f32 %v748_v41, 0.0 }
 0x195   : > { %v735_v43 = vpop.f32.mrf.mxu1 }
 0x196   : > { %v736_v45 = vadd.f32 %v1626_v42, %v735_v43  ;;  %v806_v43 = vmax.f32 %v751_v39, 0.0 }
 0x198   : > { %v801_v47 = vmax.f32 %v736_v45, 0.0  ;;  %v745_v45 = vadd.f32 %v1626_v42, %v1603_v19 }
 0x199   : > { %v783_v48 = vpop.f32.mrf.mxu2 }
 0x19a   : > { %v784_v50 = vadd.f32 %v1626_v42, %v783_v48  ;;  %1160 = vmatpush.xpose.msk.msrb.mxu2 %vm322_vm0, %v801_v47  ;;  %v804_v48 = vmax.f32 %v745_v45, 0.0 }
 0x19c   : > { %v817_v54 = vmax.f32 %v784_v50, 0.0 }
 0x19d   : > { %v738_v25 = vpop.f32.mrf.mxu1 }
 0x19e   : > { %1161 = vmatpush.xpose.msk.msrb.mxu2 %vm322_vm0, %v800_v52  ;;  %1177 = vmatpush.xpose.msk.msrb.mxu3 %vm322_vm0, %v817_v54  ;;  %v739_v19 = vadd.f32 %v1626_v42, %v738_v25 }
 0x1a0   : > { %v802_v52 = vmax.f32 %v739_v19, 0.0 }
 0x1a2   : > { %1162 = vmatpush.xpose.msk.msrb.mxu2 %vm322_vm0, %v799_v56  ;;  %1178 = vmatpush.xpose.msk.msrb.mxu3 %vm322_vm0, %v816_v58 }
 0x1a5   : > { %v741_v47 = vpop.f32.mrf.mxu1 }
 0x1a6   : > { %1163 = vmatpush.xpose.msk.msrb.mxu2 %vm322_vm0, %v798_v60  ;;  %1179 = vmatpush.xpose.msk.msrb.mxu3 %vm322_vm0, %v815_v62  ;;  %v742_v50 = vadd.f32 %v1626_v42, %v741_v47 }
 0x1a8   : > { %v803_v51 = vmax.f32 %v742_v50, 0.0 }
 0x1aa   : > { %1164 = vmatpush.xpose.msk.msrb.mxu2 %vm322_vm0, %v797_v0  ;;  %1180 = vmatpush.xpose.msk.msrb.mxu3 %vm322_vm0, %v814_v2 }
 0x1ae   : > { %1165 = vmatpush.xpose.msk.msrb.mxu2 %vm322_vm0, %v796_v4  ;;  %1181 = vmatpush.xpose.msk.msrb.mxu3 %vm322_vm0, %v813_v6 }
 0x1b2   : > { %1166 = vmatpush.xpose.msk.msrb.mxu2 %vm322_vm0, %v795_v8  ;;  %1182 = vmatpush.xpose.msk.msrb.mxu3 %vm322_vm0, %v812_v10 }
 0x1b6   : > { %1167 = vmatpush.xpose.msk.msrb.mxu2 %vm322_vm0, %v794_v12  ;;  %1183 = vmatpush.xpose.msk.msrb.mxu3 %vm322_vm0, %v811_v15 }
 0x1ba   : > { %1168 = vmatpush.xpose.msk.msrb.mxu2 %vm322_vm0, %v793_v28  ;;  %1184 = vmatpush.xpose.msk.msrb.mxu3 %vm322_vm0, %v810_v31 }
 0x1be   : > { %1169 = vmatpush.xpose.msk.msrb.mxu2 %vm322_vm0, %v792_v29  ;;  %1185 = vmatpush.xpose.msk.msrb.mxu3 %vm322_vm0, %v809_v33 }
 0x1c2   : > { %1170 = vmatpush.xpose.msk.msrb.mxu2 %vm322_vm0, %v791_v35  ;;  %1186 = vmatpush.xpose.msk.msrb.mxu3 %vm322_vm0, %v808_v24 }
 0x1c6   : > { %1171 = vmatpush.xpose.msk.msrb.mxu2 %vm322_vm0, %v790_v38  ;;  %1187 = vmatpush.xpose.msk.msrb.mxu3 %vm322_vm0, %v807_v40 }
 0x1ca   : > { %1172 = vmatpush.xpose.msk.msrb.mxu2 %vm322_vm0, %v789_v44  ;;  %1188 = vmatpush.xpose.msk.msrb.mxu3 %vm322_vm0, %v806_v43 }
 0x1ce   : > { %1173 = vmatpush.xpose.msk.msrb.mxu2 %vm322_vm0, %v788_v23  ;;  %1189 = vmatpush.xpose.msk.msrb.mxu3 %vm322_vm0, %v805_v46 }
 0x1d2   : > { %1174 = vmatpush.xpose.msk.msrb.mxu2 %vm322_vm0, %v787_v21  ;;  %1190 = vmatpush.xpose.msk.msrb.mxu3 %vm322_vm0, %v804_v48 }
 0x1d6   : > { %1175 = vmatpush.xpose.msk.msrb.mxu2 %vm322_vm0, %v786_v16  ;;  %1191 = vmatpush.xpose.msk.msrb.mxu3 %vm322_vm0, %v803_v51 }
 0x1d9   : > { %1176 = vmatmul.msk.f32.vlgmr.msrb.gmra.mxu2 %vm322_vm0, %v818_v13 }
 0x1da   : > { %1192 = vmatpush.xpose.msk.msrb.mxu3 %vm322_vm0, %v802_v52 }
 0x1dd   : > { %1193 = vmatmul.msk.f32.vlgmr.msrb.gmra.mxu3 %vm322_vm0, %v818_v13 }
 0x1e9   : > { %v823_v53 = vpop.permute.xlu0 %822 }
 0x1ea   : > { %v825_v54 = vperm.slane %v823_v53, 0 }
 0x25c   : > { %v942_v55 = vpop.f32.mrf.mxu2 }
 0x25d   : > { %v943_v42 = vadd.f32 %v942_v55, %v825_v54 }
 0x25f   : > { %v1194_v56 = vmul.f32 -1.442695, %v943_v42 }
 0x260   : > { %v962_v57 = vpop.f32.mrf.mxu3 }
 0x261   : > { %v963_v58 = vadd.f32 %v962_v57, %v825_v54  ;;  %1255 = vpow2.f32 %v1194_v56 }
 0x263   : > { %v1195_v59 = vmul.f32 -1.442695, %v963_v58 }
 0x265   : > { %1257 = vpow2.f32 %v1195_v59 }
 0x267   : > { %v1256_v60 = vpop.eup %1255 }
 0x268   : > { %v971_v61 = vadd.f32 1.0, %v1256_v60 }
 0x26a   : > { %1259 = vrcp.f32 %v971_v61  ;;  %vm978_vm4 = vweird.f32 %v971_v61  ;;  %v984_v11 = vand.u32 2147483648, %v971_v61  ;;  %v982_v14 = vand.u32 2147483647, %v971_v61 }
 0x26b   : > { %v1258_v62 = vpop.eup %1257 }
 0x26c   : > { %v972_v63 = vadd.f32 1.0, %v1258_v62  ;;  %v985_v26 = vor.u32 1.1754944e-38, %v984_v11  ;;  %vm983_vm10 = vcmp.eq.f32.partialorder %v982_v14, 8.507059e+37 }
 0x26e   : > { %1261 = vrcp.f32 %v972_v63  ;;  %v999_v7 = vand.u32 2147483648, %v972_v63  ;;  %v997_v10 = vand.u32 2147483647, %v972_v63  ;;  %vm993_vm5 = vweird.f32 %v972_v63 }
 0x270   : > { %v1260_v0 = vpop.eup %1259  ;;  %v1000_v28 = vor.u32 1.1754944e-38, %v999_v7  ;;  %vm998_vm8 = vcmp.eq.f32.partialorder %v997_v10, 8.507059e+37 }
 0x271   : > { %v974_v1 = vmul.f32 %v1260_v0, %v971_v61  ;;  %vm979_vm2 = vweird.f32 %v1260_v0 }
 0x272   : > { %vm1719_vm6 = vmor %vm978_vm4, %vm979_vm2 }
 0x273   : > { %v975_v2 = vsub.f32 1.0, %v974_v1 }
 0x274   : > { %v1262_v3 = vpop.eup %1261 }
 0x275   : > { %v989_v4 = vmul.f32 %v1262_v3, %v972_v63  ;;  %v976_v5 = vmul.f32 %v1260_v0, %v975_v2  ;;  %vm994_vm3 = vweird.f32 %v1262_v3 }
 0x276   : > { %vm995_vm7 = vmor %vm993_vm5, %vm994_vm3 }
 0x277   : > { %v990_v6 = vsub.f32 1.0, %v989_v4  ;;  %v977_v9 = vadd.f32 %v1260_v0, %v976_v5 }
 0x279   : > { %v991_v8 = vmul.f32 %v1262_v3, %v990_v6  ;;  %v981_v30 = vsel %vm1719_vm6, %v1260_v0, %v977_v9 }
 0x27a   : > { %v986_v33 = vsel %vm983_vm10, %v985_v26, %v981_v30 }
 0x27b   : > { %v992_v15 = vadd.f32 %v1262_v3, %v991_v8 }
 0x27d   : > { %v996_v31 = vsel %vm995_vm7, %v1262_v3, %v992_v15 }
 0x27e   : > { %v1001_v29 = vsel %vm998_vm8, %v1000_v28, %v996_v31 }
 0x27f   : > { %v1005_v32 = vrot.slane %v1001_v29, 7 }
 0x281   : > { %v1007_v34 = vsel %vm1006_vm9, %v986_v33, %v1005_v32 }
 0x282   : > { %1013 = vst.msk [vmem:[%s274_s6] sm:$0x3] %vm1011_vm11, %v1007_v34 }
 0x283   : > { %1290 = shalt.err (!%p1287_p3)
}
 0x284   : > { %1212 = dma.vmem_to_hbm [thread:$0]  (%p1409_p5), %s1028_s25, 32, %s1030_s9, %s1015_s10  }
 0x285 PF: > { %p1218_p4 = scmp.ge.s32.totalorder %s1325_s29, 2  ;;  %s1041_s19 = sand.u32 1, %s1313_s26  }
 0x286   : > { %s1042_s21 = scalar_lea.sflag [#allocation4], %s1041_s19 }
 0x287   : > { %p1215_p7 = pnand %p1218_p4, %p1413_p6 }
 0x289   : > { %p1216_p8 = pneg %p1215_p7 }
 0x28b   : > { %1308 = dma.done.wait (%p1216_p8), %s1042_s21, 32  }
 0x28c   : > { %1310 = vsyncadd (%p1216_p8), %s1042_s21, 4294967264  ;;  %p19_p9 = scmp.ge.s32.totalorder %s1396_s8, 4   ;;  %s1767_s26 = smov %s1317_s27 }
 0x28d   : > { %s1768_s27 = smov %s1321_s28  ;;  %s1769_s28 = smov %s1407_s11 }
 0x28e   : > { %s1770_s29 = smov %s1396_s8  ;;  %21 = sbr.rel (!%p19_p9) target bundleno = 6 (0x6), region = 83 }
 0x293   :  { %1048 = vsyncpa [#allocation4], 1 }
 0x294   :  { %1050 = vsyncpa [#allocation4 + $0x1], 1 }

</bundles_post_ra>
